<compile_context>
chip_gen: v7x
topology: tpu7x:2x2x1
jax: 0.10.0
libtpu: 0.0.40
codegen_flags: <defaults>
</compile_context>

<pallas_src>
import functools

import jax
import jax.numpy as jnp
from jax.experimental import pallas as pl
from jax.experimental.pallas import tpu as pltpu

_LANES = 128
_SUBLANES = 8


def _round_up(x, m):
    return ((x + m - 1) // m) * m


def _combined_loss_jnp(p, t, w0, w1):
    d = p.astype(jnp.float32) - t.astype(jnp.float32)
    return w0 * jnp.mean(d * d) + w1 * jnp.mean(jnp.abs(d))


def _chip_defaults():
    """(num_partials, tile_rows for f32) chosen per TPU generation."""
    try:
        kind = jax.devices()[0].device_kind.lower()
    except Exception:
        kind = ""
    if "v7" in kind:
        # 2 TensorCores per chip: shard the leading grid axis across them.
        # 8192 rows -> 4 MiB f32 blocks, 16 MiB double-buffered inputs per TC,
        # well under v7x's 64 MiB physical VMEM.
        return 2, 8192
    # Single-TensorCore v5e / v6e: no partial axis (avoids duplicate-block
    # re-reads + always-on mask); 4096 rows -> 2 MiB blocks, 8 MiB
    # double-buffered, fits v5e's 16 MiB default scoped VMEM.
    return 1, 4096


def _combined_loss_kernel(pred_ref, tgt_ref, out_ref, *,
                          tile_rows, blocks_per_core, num_blocks, m_rows,
                          need_mask, chunk_rows, unroll):
    """Accumulates [sum((p-t)^2), sum(|p-t|)] into a per-core (1,2,8,128) slab."""
    c = pl.program_id(0)
    j = pl.program_id(1)

    # Output block index only depends on the leading (core) axis, so it stays
    # resident in VMEM across the inner reduction axis: it IS the accumulator.
    @pl.when(j == 0)
    def _():
        out_ref[...] = jnp.zeros_like(out_ref)

    n_chunks = tile_rows // chunk_rows

    def accumulate(masked):
        if masked:
            blk = c * blocks_per_core + j        # UNclamped step index
            base = blk * tile_rows               # global row of this block's row 0
            row_iota = jax.lax.broadcasted_iota(
                jnp.int32, (chunk_rows, _LANES), 0)

        def body(i, carry):
            acc_sq, acc_abs = carry
            r0 = pl.multiple_of(i * chunk_rows, chunk_rows)
            p = pred_ref[pl.ds(r0, chunk_rows), :].astype(jnp.float32)
            t = tgt_ref[pl.ds(r0, chunk_rows), :].astype(jnp.float32)
            d = p - t
            if masked:
                # Keep this a select (not a multiply) so garbage in padded /
                # duplicate rows can never propagate NaNs.
                valid = (base + r0 + row_iota) < m_rows
                d = jnp.where(valid, d, 0.0)
            # Fold chunk rows with plain VALU adds (no cross-lane reduce);
            # `diff` lives only as a handful of vregs.
            d = d.reshape(chunk_rows // _SUBLANES, _SUBLANES, _LANES)
            acc_sq = acc_sq + jnp.sum(d * d, axis=0)
            acc_abs = acc_abs + jnp.sum(jnp.abs(d), axis=0)
            return acc_sq, acc_abs

        init = (jnp.zeros((_SUBLANES, _LANES), jnp.float32),
                jnp.zeros((_SUBLANES, _LANES), jnp.float32))
        acc_sq, acc_abs = jax.lax.fori_loop(0, n_chunks, body, init,
                                            unroll=unroll)
        out_ref[0, 0, :, :] += acc_sq
        out_ref[0, 1, :, :] += acc_abs

    if need_mask:
        # Only the (single) partial edge block and clamped duplicate steps pay
        # the mask; all full blocks take the pure unmasked streaming path.
        blk = c * blocks_per_core + j
        is_edge = blk >= (num_blocks - 1)

        @pl.when(jnp.logical_not(is_edge))
        def _():
            accumulate(False)

        @pl.when(is_edge)
        def _():
            accumulate(True)
    else:
        accumulate(False)


def combined_loss(predictions, targets, loss_weights=(1.0, 1.0), *,
                  tile_rows=None, num_partials=None,
                  small_input_threshold=1 << 15, force_kernel=False):
    """w0 * mean((p - t)^2) + w1 * mean(|p - t|) via a Pallas TPU kernel."""
    assert predictions.shape == targets.shape
    n = int(predictions.size)
    w0 = float(loss_weights[0])
    w1 = float(loss_weights[1])
    if n == 0:
        return jnp.float32(0.0)

    p = predictions.reshape(-1)
    t = targets.reshape(-1)

    n_main = (n // _LANES) * _LANES
    if n_main == 0 or (not force_kernel and n < small_input_threshold):
        # Whole problem is a handful of vregs: kernel dispatch + grid overhead
        # costs more than just computing it directly.
        return _combined_loss_jnp(p, t, w0, w1)

    itemsize = int(jnp.dtype(predictions.dtype).itemsize)
    auto_partials, auto_tile_rows = _chip_defaults()
    if num_partials is None:
        num_partials = auto_partials
    if tile_rows is None:
        tile_rows = auto_tile_rows
        if itemsize < 4:
            # bf16 / fp8 inputs: same VMEM footprint per block, less DMA time
            # per step -> grow the block so per-step overhead stays small.
            tile_rows *= 4 // itemsize

    # Lane-aligned prefix goes through the kernel (free reshape of a contiguous
    # tensor); the <128-element ragged tail is reduced in the jnp epilogue
    # instead of jnp.pad-ing (re-copying) both full tensors.
    p_main = p if n_main == n else p[:n_main]
    t_main = t if n_main == n else t[:n_main]
    m_rows = n_main // _LANES
    p2 = p_main.reshape(m_rows, _LANES)
    t2 = t_main.reshape(m_rows, _LANES)

    # Sublane alignment depends on dtype packing (8 rows f32, 16 bf16, 32 int8).
    align = _SUBLANES * max(1, 4 // itemsize)
    tr = min(_round_up(int(tile_rows), align), _round_up(m_rows, align))
    num_blocks = pl.cdiv(m_rows, tr)
    bpc = pl.cdiv(num_blocks, num_partials)            # row-blocks per partial
    need_mask = (num_partials * bpc * tr) != m_rows    # partial block / idle steps

    chunk_rows = 64 if tr % 64 == 0 else align
    n_chunks = tr // chunk_rows
    unroll = max(1, min(4, n_chunks))

    if num_partials * bpc == num_blocks:
        in_map = lambda c, j: (c * bpc + j, 0)
    else:
        # Steps past the last block re-read a valid block; their contribution
        # is zeroed by the in-kernel row mask (is_edge branch).
        in_map = lambda c, j: (jnp.minimum(c * bpc + j, num_blocks - 1), 0)

    kernel = functools.partial(
        _combined_loss_kernel,
        tile_rows=tr, blocks_per_core=bpc, num_blocks=num_blocks,
        m_rows=m_rows, need_mask=need_mask,
        chunk_rows=chunk_rows, unroll=unroll)

    out_bytes = num_partials * 2 * _SUBLANES * _LANES * 4
    cost = pl.CostEstimate(flops=5 * n_main, transcendentals=0,
                           bytes_accessed=2 * n_main * itemsize + out_bytes)
    # 2 inputs x 2 pipeline buffers per block, plus headroom for output/temps.
    vmem_limit = int(4 * tr * _LANES * itemsize) + (16 << 20)

    def run(first_axis_sem):
        return pl.pallas_call(
            kernel,
            out_shape=jax.ShapeDtypeStruct(
                (num_partials, 2, _SUBLANES, _LANES), jnp.float32),
            grid_spec=pltpu.PrefetchScalarGridSpec(
                num_scalar_prefetch=0,
                grid=(num_partials, bpc),
                in_specs=[pl.BlockSpec((tr, _LANES), in_map),
                          pl.BlockSpec((tr, _LANES), in_map)],
                out_specs=pl.BlockSpec((1, 2, _SUBLANES, _LANES),
                                       lambda c, j: (c, 0, 0, 0)),
            ),
            compiler_params=pltpu.CompilerParams(
                dimension_semantics=(first_axis_sem, pltpu.ARBITRARY),
                vmem_limit_bytes=vmem_limit),
            cost_estimate=cost,
        )(p2, t2)

    if num_partials > 1:
        # v7x: shard the leading axis across the 2 TensorCores.
        try:
            partials = run(pltpu.CORE_PARALLEL)
        except Exception:
            partials = run(pltpu.PARALLEL)
    else:
        partials = run(pltpu.ARBITRARY)

    # Tiny epilogue: cross-partial / cross-lane reduce, ragged tail, mean,
    # weighted combination.
    sum_sq = jnp.sum(partials[:, 0])
    sum_abs = jnp.sum(partials[:, 1])
    if n_main != n:
        dt = p[n_main:].astype(jnp.float32) - t[n_main:].astype(jnp.float32)
        sum_sq = sum_sq + jnp.sum(dt * dt)
        sum_abs = sum_abs + jnp.sum(jnp.abs(dt))

    inv_n = 1.0 / float(n)
    return w0 * (sum_sq * inv_n) + w1 * (sum_abs * inv_n)


if __name__ == "__main__":
    key = jax.random.PRNGKey(0)
    kp, kt = jax.random.split(key)

    # Small NCHW-shaped regression tensors (predictions and targets, same shape).
    x_shape = (2, 4, 16, 16)
    predictions = jax.random.normal(kp, x_shape, dtype=jnp.float32)
    targets = jax.random.normal(kt, x_shape, dtype=jnp.float32)

    weights = (1.0, 1.0)  # CombinedLoss default loss_weights
    loss = jax.block_until_ready(
        combined_loss(predictions, targets, weights, force_kernel=True))
    diff = predictions - targets
    ref = weights[0] * jnp.mean(diff * diff) + weights[1] * jnp.mean(jnp.abs(diff))
    assert jnp.allclose(loss, ref, rtol=1e-5, atol=1e-5), (loss, ref)

    # Non-default weights, multiple row-blocks accumulated across the grid.
    x2_shape = (2, 4, 32, 32)
    p2_in = jax.random.normal(jax.random.PRNGKey(1), x2_shape, dtype=jnp.float32)
    t2_in = jax.random.normal(jax.random.PRNGKey(2), x2_shape, dtype=jnp.float32)
    w2 = (0.7, 0.3)
    loss2 = jax.block_until_ready(
        combined_loss(p2_in, t2_in, w2, tile_rows=16, force_kernel=True))
    d2 = p2_in - t2_in
    ref2 = w2[0] * jnp.mean(d2 * d2) + w2[1] * jnp.mean(jnp.abs(d2))
    assert jnp.allclose(loss2, ref2, rtol=1e-5, atol=1e-5), (loss2, ref2)

    # Ragged case (numel % 128 != 0): masked edge block + jnp tail epilogue.
    p3_in = jax.random.normal(jax.random.PRNGKey(3), (3, 100), dtype=jnp.float32)
    t3_in = jax.random.normal(jax.random.PRNGKey(4), (3, 100), dtype=jnp.float32)
    loss3 = jax.block_until_ready(
        combined_loss(p3_in, t3_in, force_kernel=True))
    d3 = p3_in - t3_in
    ref3 = jnp.mean(d3 * d3) + jnp.mean(jnp.abs(d3))
    assert jnp.allclose(loss3, ref3, rtol=1e-5, atol=1e-5), (loss3, ref3)

    print("KERNEL_OK")
</pallas_src>

<mosaic_0001>
module attributes {stable_mosaic.version = 11 : i64} {
  func.func @_combined_loss_kernel(%arg0: i32, %arg1: i32, %arg2: memref<16x128xf32, #tpu.memory_space<vmem>>, %arg3: memref<16x128xf32, #tpu.memory_space<vmem>>, %arg4: memref<1x2x8x128xf32, #tpu.memory_space<vmem>>) attributes {dimension_semantics = [#tpu.dimension_semantics<arbitrary>, #tpu.dimension_semantics<arbitrary>], iteration_bounds = array<i64: 1, 1>, scalar_prefetch = 0 : i64, scratch_operands = 0 : i64, tpu.core_type = #tpu.core_type<tc>, window_params = [{transform_indices = @transform_0, window_bounds = array<i64: 16, 128>}, {transform_indices = @transform_1, window_bounds = array<i64: 16, 128>}, {transform_indices = @transform_2, window_bounds = array<i64: 1, 2, 8, 128>}]} {
    %c0_i32 = arith.constant 0 : i32
    %0 = arith.cmpi eq, %arg1, %c0_i32 : i32
    %1 = arith.extui %0 : i1 to i32
    %c0_i32_0 = arith.constant 0 : i32
    %2 = arith.cmpi ne, %1, %c0_i32_0 : i32
    scf.if %2 {
      %cst_26 = arith.constant 0.000000e+00 : f32
      %45 = vector.broadcast %cst_26 : f32 to vector<1x2x8x128xf32>
      %c0_27 = arith.constant 0 : index
      %c0_28 = arith.constant 0 : index
      %c0_29 = arith.constant 0 : index
      %c0_30 = arith.constant 0 : index
      %46 = vector.load %arg4[%c0_27, %c0_28, %c0_29, %c0_30] : memref<1x2x8x128xf32, #tpu.memory_space<vmem>>, vector<1x2x8x128xf32>
      tpu.vector_store %arg4[%c0_27, %c0_28, %c0_29, %c0_30], %45 {strides = array<i32>} : memref<1x2x8x128xf32, #tpu.memory_space<vmem>>, vector<1x2x8x128xf32>,
    } else {
    }
    %cst = arith.constant 0.000000e+00 : f32
    %3 = vector.broadcast %cst : f32 to vector<8x128xf32>
    %cst_1 = arith.constant 0.000000e+00 : f32
    %4 = vector.broadcast %cst_1 : f32 to vector<8x128xf32>
    %c0_i32_2 = arith.constant 0 : i32
    %c8_i32 = arith.constant 8 : i32
    %5 = arith.muli %c0_i32_2, %c8_i32 : i32
    %6 = tpu.assume_multiple %5, 8 : i32
    %7 = arith.index_cast %6 : i32 to index
    %c0 = arith.constant 0 : index
    %8 = vector.load %arg2[%7, %c0] : memref<16x128xf32, #tpu.memory_space<vmem>>, vector<8x128xf32>
    %9 = arith.index_cast %6 : i32 to index
    %c0_3 = arith.constant 0 : index
    %10 = vector.load %arg3[%9, %c0_3] : memref<16x128xf32, #tpu.memory_space<vmem>>, vector<8x128xf32>
    %11 = arith.subf %8, %10 : vector<8x128xf32>
    %12 = vector.shape_cast %11 : vector<8x128xf32> to vector<1x8x128xf32>
    %13 = arith.mulf %12, %12 : vector<1x8x128xf32>
    %cst_4 = arith.constant dense<0.000000e+00> : vector<8x128xf32>
    %14 = vector.multi_reduction <add>, %13, %cst_4 [0] : vector<1x8x128xf32> to vector<8x128xf32>
    %15 = arith.addf %3, %14 : vector<8x128xf32>
    %16 = math.absf %12 : vector<1x8x128xf32>
    %cst_5 = arith.constant dense<0.000000e+00> : vector<8x128xf32>
    %17 = vector.multi_reduction <add>, %16, %cst_5 [0] : vector<1x8x128xf32> to vector<8x128xf32>
    %18 = arith.addf %4, %17 : vector<8x128xf32>
    %c1_i32 = arith.constant 1 : i32
    %c8_i32_6 = arith.constant 8 : i32
    %19 = arith.muli %c1_i32, %c8_i32_6 : i32
    %20 = tpu.assume_multiple %19, 8 : i32
    %21 = arith.index_cast %20 : i32 to index
    %c0_7 = arith.constant 0 : index
    %22 = vector.load %arg2[%21, %c0_7] : memref<16x128xf32, #tpu.memory_space<vmem>>, vector<8x128xf32>
    %23 = arith.index_cast %20 : i32 to index
    %c0_8 = arith.constant 0 : index
    %24 = vector.load %arg3[%23, %c0_8] : memref<16x128xf32, #tpu.memory_space<vmem>>, vector<8x128xf32>
    %25 = arith.subf %22, %24 : vector<8x128xf32>
    %26 = vector.shape_cast %25 : vector<8x128xf32> to vector<1x8x128xf32>
    %27 = arith.mulf %26, %26 : vector<1x8x128xf32>
    %cst_9 = arith.constant dense<0.000000e+00> : vector<8x128xf32>
    %28 = vector.multi_reduction <add>, %27, %cst_9 [0] : vector<1x8x128xf32> to vector<8x128xf32>
    %29 = arith.addf %15, %28 : vector<8x128xf32>
    %30 = math.absf %26 : vector<1x8x128xf32>
    %cst_10 = arith.constant dense<0.000000e+00> : vector<8x128xf32>
    %31 = vector.multi_reduction <add>, %30, %cst_10 [0] : vector<1x8x128xf32> to vector<8x128xf32>
    %32 = arith.addf %18, %31 : vector<8x128xf32>
    %c2_i32 = arith.constant 2 : i32
    %c0_11 = arith.constant 0 : index
    %c0_12 = arith.constant 0 : index
    %c0_13 = arith.constant 0 : index
    %c0_14 = arith.constant 0 : index
    %33 = vector.load %arg4[%c0_11, %c0_12, %c0_13, %c0_14] : memref<1x2x8x128xf32, #tpu.memory_space<vmem>>, vector<1x1x8x128xf32>
    %34 = vector.shape_cast %33 : vector<1x1x8x128xf32> to vector<8x128xf32>
    %35 = arith.addf %34, %29 : vector<8x128xf32>
    %c0_15 = arith.constant 0 : index
    %c0_16 = arith.constant 0 : index
    %c0_17 = arith.constant 0 : index
    %c0_18 = arith.constant 0 : index
    %36 = vector.load %arg4[%c0_15, %c0_16, %c0_17, %c0_18] : memref<1x2x8x128xf32, #tpu.memory_space<vmem>>, vector<1x1x8x128xf32>
    %37 = vector.shape_cast %36 : vector<1x1x8x128xf32> to vector<8x128xf32>
    %38 = vector.shape_cast %35 : vector<8x128xf32> to vector<1x1x8x128xf32>
    tpu.vector_store %arg4[%c0_15, %c0_16, %c0_17, %c0_18], %38 {strides = array<i32>} : memref<1x2x8x128xf32, #tpu.memory_space<vmem>>, vector<1x1x8x128xf32>,
    %c0_19 = arith.constant 0 : index
    %c1 = arith.constant 1 : index
    %c0_20 = arith.constant 0 : index
    %c0_21 = arith.constant 0 : index
    %39 = vector.load %arg4[%c0_19, %c1, %c0_20, %c0_21] : memref<1x2x8x128xf32, #tpu.memory_space<vmem>>, vector<1x1x8x128xf32>
    %40 = vector.shape_cast %39 : vector<1x1x8x128xf32> to vector<8x128xf32>
    %41 = arith.addf %40, %32 : vector<8x128xf32>
    %c0_22 = arith.constant 0 : index
    %c1_23 = arith.constant 1 : index
    %c0_24 = arith.constant 0 : index
    %c0_25 = arith.constant 0 : index
    %42 = vector.load %arg4[%c0_22, %c1_23, %c0_24, %c0_25] : memref<1x2x8x128xf32, #tpu.memory_space<vmem>>, vector<1x1x8x128xf32>
    %43 = vector.shape_cast %42 : vector<1x1x8x128xf32> to vector<8x128xf32>
    %44 = vector.shape_cast %41 : vector<8x128xf32> to vector<1x1x8x128xf32>
    tpu.vector_store %arg4[%c0_22, %c1_23, %c0_24, %c0_25], %44 {strides = array<i32>} : memref<1x2x8x128xf32, #tpu.memory_space<vmem>>, vector<1x1x8x128xf32>,
    return
  }
  func.func @transform_0(%arg0: i32, %arg1: i32) -> (i32, i32) {
    %c1_i32 = arith.constant 1 : i32
    %0 = arith.muli %arg0, %c1_i32 : i32
    %1 = arith.addi %0, %arg1 : i32
    %c0_i32 = arith.constant 0 : i32
    %c0_i32_0 = arith.constant 0 : i32
    return %1, %c0_i32 : i32, i32
  }
  func.func @transform_1(%arg0: i32, %arg1: i32) -> (i32, i32) {
    %c1_i32 = arith.constant 1 : i32
    %0 = arith.muli %arg0, %c1_i32 : i32
    %1 = arith.addi %0, %arg1 : i32
    %c0_i32 = arith.constant 0 : i32
    %c0_i32_0 = arith.constant 0 : i32
    return %1, %c0_i32 : i32, i32
  }
  func.func @transform_2(%arg0: i32, %arg1: i32) -> (i32, i32, i32, i32) {
    %c0_i32 = arith.constant 0 : i32
    %c0_i32_0 = arith.constant 0 : i32
    %c0_i32_1 = arith.constant 0 : i32
    %c0_i32_2 = arith.constant 0 : i32
    return %arg0, %c0_i32, %c0_i32_0, %c0_i32_1 : i32, i32, i32, i32
  }
}

</mosaic_0001>

<bundles_post_ra>
// kernel: tpu_custom_call.1
= control target key start
LH: loop header
LB: loop body
LE: loop exit
PB: predicated region body
PF: predicated region fallthrough
CT: control target
= control target key end

     0   :  { %7 = vsyncpa [#allocation3], 0  ;;  %s246_s0 = inlined_call_operand.hbm [shape: f32[16,128], index: 0, kind: input, shape index: {}]   ;;  %s247_s1 = inlined_call_operand.hbm [shape: f32[16,128], index: 1, kind: input, shape index: {}]   ;;  %s248_s2 = inlined_call_operand.hbm [shape: f32[1,2,8,128], index: 2, kind: output, shape index: {}]  }
   0x1   :  { %8 = vsyncpa [#allocation6], 0 }
   0x2   :  { %9 = vsyncpa [#allocation4], 0  ;;  %s181_s9 = smov [#allocation2]   ;;  %s109_s13 = scalar_lea.hbm %s246_s0, 256 }
   0x3   :  { %s19_s10 = sshll.u32 %s181_s9, 4  ;;  %p110_p0 = scmp.ne.s32.totalorder %s246_s0, %s109_s13  ;;  %s20_s10 = int_to_ptr.vmem [resolvable:$true] %s19_s10 }
   0x4   :  { %p113_p1 = scmp.lt.u32.totalorder %s109_s13, %s246_s0 }
   0x6   :  { %p115_p2 = pnand %p113_p1, %p110_p0 }
   0x8   :  { %118 = shalt.err (!%p115_p2)
}
   0x9   :  { %s119_s18 = scalar_lea.vmem %s20_s10, 256  ;;  %p124_p4 = scmp.lt.s32.totalorder %s20_s10, %s20_s10 }
   0xa   :  { %p120_p3 = scmp.ne.s32.totalorder %s20_s10, %s119_s18  ;;  %p125_p5 = scmp.lt.s32.totalorder %s119_s18, %s119_s18 }
   0xc   :  { %p126_p6 = por %p125_p5, %p124_p4 }
   0xe   :  { %p127_p7 = pnand %p126_p6, %p120_p3 }
  0x10   :  { %130 = shalt.err (!%p127_p7)
}
  0x11   :  { %s182_s19 = smov 128   ;;  %s183_s20 = smov 8  }
  0x12   :  { %25 = dma.hbm_to_vmem [thread:$0]  %s246_s0, 256, %s20_s10, [#allocation3], %s182_s19, %s182_s19, %s183_s20  }
  0x13   :  { %s184_s23 = smov [#allocation5]   ;;  %s131_s27 = scalar_lea.hbm %s247_s1, 256 }
  0x14   :  { %s35_s24 = sshll.u32 %s184_s23, 4  ;;  %p132_p8 = scmp.ne.s32.totalorder %s247_s1, %s131_s27  ;;  %s36_s24 = int_to_ptr.vmem [resolvable:$true] %s35_s24 }
  0x15   :  { %p135_p9 = scmp.lt.u32.totalorder %s131_s27, %s247_s1 }
  0x17   :  { %p137_p10 = pnand %p135_p9, %p132_p8 }
  0x19   :  { %140 = shalt.err (!%p137_p10)
}
  0x1a   :  { %s141_s4 = scalar_lea.vmem %s36_s24, 256  ;;  %p146_p12 = scmp.lt.s32.totalorder %s36_s24, %s36_s24 }
  0x1b   :  { %p142_p11 = scmp.ne.s32.totalorder %s36_s24, %s141_s4  ;;  %p147_p13 = scmp.lt.s32.totalorder %s141_s4, %s141_s4 }
  0x1d   :  { %p148_p0 = por %p147_p13, %p146_p12 }
  0x1f   :  { %p149_p1 = pnand %p148_p0, %p142_p11 }
  0x21   :  { %152 = shalt.err (!%p149_p1)
}
  0x22   :  { %41 = dma.hbm_to_vmem [thread:$0]  %s247_s1, 256, %s36_s24, [#allocation6], %s182_s19, %s182_s19, %s183_s20  }
  0x23   :  { %175 = dma.done.wait [#allocation3], 256  }
  0x24   :  { %176 = vsyncadd [#allocation3], 4294967040 }
  0x25   :  { %177 = dma.done.wait [#allocation6], 256  }
  0x26   :  { %178 = vsyncadd [#allocation6], 4294967040  ;;  %v58_v0 = vld [vmem:[#allocation2] sm:$0xff]  ;;  %v59_v1 = vld [vmem:[#allocation5] sm:$0xff]  ;;  %s185_s6 = smov [#allocation7]  }
  0x27   :  { %v68_v2 = vld [vmem:[#allocation2 + $0x8] sm:$0xff]  ;;  %v60_v3 = vsub.f32 %v58_v0, %v59_v1  ;;  %v70_v4 = vld [vmem:[#allocation5 + $0x8] sm:$0xff]  ;;  %s90_s7 = sshll.u32 %s185_s6, 4  ;;  %s91_s7 = int_to_ptr.vmem [resolvable:$true] %s90_s7 }
  0x28   :  { %v71_v5 = vsub.f32 %v68_v2, %v70_v4  ;;  %s153_s1 = scalar_lea.vmem %s91_s7, 256  ;;  %p158_p3 = scmp.lt.s32.totalorder %s91_s7, %s91_s7 }
  0x29   :  { %v61_v6 = vmul.f32 %v60_v3, %v60_v3  ;;  %v64_v7 = vand.u32 2147483647, %v60_v3  ;;  %p154_p2 = scmp.ne.s32.totalorder %s91_s7, %s153_s1  ;;  %p159_p4 = scmp.lt.s32.totalorder %s153_s1, %s153_s1 }
  0x2a   :  { %v72_v8 = vmul.f32 %v71_v5, %v71_v5  ;;  %v75_v9 = vand.u32 2147483647, %v71_v5 }
  0x2b   :  { %p160_p5 = por %p159_p4, %p158_p3 }
  0x2c   :  { %v74_v10 = vadd.f32 %v72_v8, %v61_v6  ;;  %v77_v11 = vadd.f32 %v75_v9, %v64_v7 }
  0x2d   :  { %p161_p6 = pnand %p160_p5, %p154_p2 }
  0x2e   :  { %80 = vst [vmem:[#allocation7] sm:$0xff] %v74_v10  ;;  %84 = vst [vmem:[#allocation7 + $0x8] sm:$0xff] %v77_v11 }
  0x2f   :  { %164 = shalt.err (!%p161_p6)
}
  0x30   :  { %s165_s10 = scalar_lea.hbm %s248_s2, 256 }
  0x31   :  { %p166_p7 = scmp.ne.s32.totalorder %s248_s2, %s165_s10  ;;  %p169_p8 = scmp.lt.u32.totalorder %s165_s10, %s248_s2 }
  0x33   :  { %p171_p9 = pnand %p169_p8, %p166_p7 }
  0x35   :  { %174 = shalt.err (!%p171_p9)
}
  0x36   :  { %96 = dma.vmem_to_hbm [thread:$0]  %s91_s7, 256, %s248_s2, [#allocation4], %s182_s19, %s182_s19, %s183_s20  }
  0x37   :  { %179 = dma.done.wait [#allocation4], 256  }
  0x38   :  { %180 = vsyncadd [#allocation4], 4294967040 }
  0x39   :  { %100 = vsyncpa [#allocation3], 1 }
  0x3a   :  { %101 = vsyncpa [#allocation6], 1 }
  0x3b   :  { %102 = vsyncpa [#allocation4], 1 }

</bundles_post_ra>
